<compile_context>
chip_gen: v5e
topology: v5e:2x2
jax: 0.10.0
libtpu: 0.0.40
codegen_flags: <defaults>
</compile_context>

<pallas_src>
import functools

import jax
import jax.numpy as jnp
from jax.experimental import pallas as pl
from jax.experimental.pallas import tpu as pltpu

LN_EPS = 1e-5  # nn.LayerNorm default


def _round_up(x, m):
    return ((x + m - 1) // m) * m


def prenorm_linear_kernel(x_ref, gamma_ref, beta_ref, w_ref, b_ref, o_ref,
                          *, true_dim):
    # x_ref: (tm, dim_p) tile of token rows (channels zero-padded past true_dim)
    # gamma/beta/b: (1, dim_p) f32, zero-padded past true_dim
    # w_ref: (dim_p, dim_p) in the matmul dtype, zero-padded rows/cols
    x = x_ref[...].astype(jnp.float32)

    # --- LayerNorm: fused one-pass statistics over the real channels ---
    # Padded lanes are zero, so they contribute nothing to either sum.
    inv_dim = jnp.float32(1.0 / true_dim)
    s1 = jnp.sum(x, axis=-1, keepdims=True)
    s2 = jnp.sum(x * x, axis=-1, keepdims=True)
    mean = s1 * inv_dim
    var = jnp.maximum(s2 * inv_dim - mean * mean, 0.0)
    inv_std = jax.lax.rsqrt(var + LN_EPS)

    # gamma/beta are zero beyond true_dim, so padded lanes of y are exactly 0.
    y = (x - mean) * inv_std * gamma_ref[...] + beta_ref[...]

    # --- fn(.) == Linear(dim, dim): MXU matmul in the weight dtype (bf16 stays
    # bf16), f32 accumulation; no per-iteration f32 cast of the weight.
    out = jnp.dot(y.astype(w_ref.dtype), w_ref[...],
                  preferred_element_type=jnp.float32)
    out = out + b_ref[...]

    o_ref[...] = out.astype(o_ref.dtype)


def prenorm(x, gamma, beta, w, b, *, tm=None):
    """x: (B, N, dim) -> (B, N, dim). LayerNorm(dim) then Linear(dim, dim)."""
    B, N, dim = x.shape
    rows = B * N

    x_bytes = jnp.dtype(x.dtype).itemsize
    w_bytes = x_bytes  # weight is fed to the MXU in x.dtype

    # Lane-dense channel axis: pad to a multiple of 128.
    dim_p = max(_round_up(dim, 128), 128)

    # Sublane granularity for the row tile (8 for f32, 16 for bf16, 32 for i8).
    sub = {1: 32, 2: 16, 4: 8}[x_bytes]

    if tm is None:
        # Size the row tile against a conservative scoped-VMEM budget (works
        # under v5e's 16 MiB default and leaves headroom on v7x's 64 MiB VMEM):
        #   2x (tm, dim_p) input + 2x (tm, dim_p) output double-buffers
        # + 2x (dim_p, dim_p) resident weight + small params.
        budget = 12 * 1024 * 1024
        fixed = 2 * dim_p * dim_p * w_bytes + 16 * dim_p * 4
        per_row = 2 * dim_p * (x_bytes + x_bytes)
        tm = (budget - fixed) // max(per_row, 1)
        tm = max(sub, min(1024, tm, _round_up(rows, sub)))
        tm = (tm // sub) * sub

    rows_p = _round_up(rows, tm)
    grid = rows_p // tm

    # --- Pad / pre-cast everything once in the wrapper (no per-iter casts) ---
    x2 = jnp.pad(x.reshape(rows, dim), ((0, rows_p - rows), (0, dim_p - dim)))
    gamma2 = jnp.pad(gamma.astype(jnp.float32), (0, dim_p - dim)).reshape(1, dim_p)
    beta2 = jnp.pad(beta.astype(jnp.float32), (0, dim_p - dim)).reshape(1, dim_p)
    b2 = jnp.pad(b.astype(jnp.float32), (0, dim_p - dim)).reshape(1, dim_p)
    w2 = jnp.pad(w.astype(x.dtype), ((0, dim_p - dim), (0, dim_p - dim)))

    cost = pl.CostEstimate(
        flops=2 * rows * dim * dim + 8 * rows * dim,
        transcendentals=rows,
        bytes_accessed=2 * rows * dim * x_bytes + dim * dim * w_bytes + 3 * dim * 4,
    )

    kernel = functools.partial(prenorm_linear_kernel, true_dim=dim)

    out2 = pl.pallas_call(
        kernel,
        out_shape=jax.ShapeDtypeStruct((rows_p, dim_p), x.dtype),
        grid_spec=pltpu.PrefetchScalarGridSpec(
            num_scalar_prefetch=0,
            grid=(grid,),
            in_specs=[
                pl.BlockSpec((tm, dim_p), lambda i: (i, 0)),      # x rows tile
                pl.BlockSpec((1, dim_p), lambda i: (0, 0)),       # gamma (f32)
                pl.BlockSpec((1, dim_p), lambda i: (0, 0)),       # beta  (f32)
                pl.BlockSpec((dim_p, dim_p), lambda i: (0, 0)),   # fn weight
                pl.BlockSpec((1, dim_p), lambda i: (0, 0)),       # fn bias (f32)
            ],
            out_specs=pl.BlockSpec((tm, dim_p), lambda i: (i, 0)),
        ),
        compiler_params=pltpu.CompilerParams(
            dimension_semantics=("parallel",)),
        cost_estimate=cost,
    )(x2, gamma2, beta2, w2, b2)

    return out2[:rows, :dim].reshape(B, N, dim)


if __name__ == "__main__":
    key = jax.random.PRNGKey(0)
    B, N, dim = 2, 8, 32

    kx, kw, kb = jax.random.split(key, 3)
    x = jax.random.normal(kx, (B, N, dim), dtype=jnp.float32)

    # LayerNorm params: PyTorch default init (gamma=1, beta=0)
    gamma = jnp.ones((dim,), dtype=jnp.float32)
    beta = jnp.zeros((dim,), dtype=jnp.float32)

    # fn := Linear(dim, dim), deterministic init. Stored as (in, out) so the
    # kernel computes y @ W + b (equivalent to PyTorch y @ W_pt.T + b).
    w = jax.random.normal(kw, (dim, dim), dtype=jnp.float32) * 0.02
    b = jax.random.normal(kb, (dim,), dtype=jnp.float32) * 0.02

    out = prenorm(x, gamma, beta, w, b)
    jax.block_until_ready(out)

    # quick sanity check against pure-JAX reference
    mean = jnp.mean(x, axis=-1, keepdims=True)
    var = jnp.mean((x - mean) ** 2, axis=-1, keepdims=True)
    ref = (x - mean) / jnp.sqrt(var + LN_EPS) * gamma + beta
    ref = ref @ w + b
    assert jnp.allclose(out, ref, atol=1e-4, rtol=1e-4), "mismatch vs reference"

    print("KERNEL_OK")
</pallas_src>

<mosaic_0001>
module attributes {stable_mosaic.version = 11 : i64} {
  func.func @prenorm_linear_kernel(%arg0: i32, %arg1: memref<16x128xf32, #tpu.memory_space<vmem>>, %arg2: memref<1x128xf32, #tpu.memory_space<vmem>>, %arg3: memref<1x128xf32, #tpu.memory_space<vmem>>, %arg4: memref<128x128xf32, #tpu.memory_space<vmem>>, %arg5: memref<1x128xf32, #tpu.memory_space<vmem>>, %arg6: memref<16x128xf32, #tpu.memory_space<vmem>>) attributes {dimension_semantics = [#tpu.dimension_semantics<parallel>], iteration_bounds = array<i64: 1>, scalar_prefetch = 0 : i64, scratch_operands = 0 : i64, tpu.core_type = #tpu.core_type<tc>, window_params = [{transform_indices = @transform_0, window_bounds = array<i64: 16, 128>}, {pipeline_mode = #tpu.pipeline_mode<synchronous>, transform_indices = @transform_1, window_bounds = array<i64: 1, 128>}, {pipeline_mode = #tpu.pipeline_mode<synchronous>, transform_indices = @transform_2, window_bounds = array<i64: 1, 128>}, {pipeline_mode = #tpu.pipeline_mode<synchronous>, transform_indices = @transform_3, window_bounds = array<i64: 128, 128>}, {pipeline_mode = #tpu.pipeline_mode<synchronous>, transform_indices = @transform_4, window_bounds = array<i64: 1, 128>}, {transform_indices = @transform_5, window_bounds = array<i64: 16, 128>}]} {
    %c0 = arith.constant 0 : index
    %c0_0 = arith.constant 0 : index
    %0 = vector.load %arg1[%c0, %c0_0] : memref<16x128xf32, #tpu.memory_space<vmem>>, vector<16x128xf32>
    %cst = arith.constant dense<0.000000e+00> : vector<16xf32>
    %1 = vector.multi_reduction <add>, %0, %cst [1] : vector<16x128xf32> to vector<16xf32>
    %2 = vector.shape_cast %1 : vector<16xf32> to vector<16x1xf32>
    %3 = arith.mulf %0, %0 : vector<16x128xf32>
    %cst_1 = arith.constant dense<0.000000e+00> : vector<16xf32>
    %4 = vector.multi_reduction <add>, %3, %cst_1 [1] : vector<16x128xf32> to vector<16xf32>
    %5 = vector.shape_cast %4 : vector<16xf32> to vector<16x1xf32>
    %cst_2 = arith.constant 3.125000e-02 : f32
    %6 = vector.broadcast %cst_2 : f32 to vector<16x1xf32>
    %7 = arith.mulf %2, %6 : vector<16x1xf32>
    %cst_3 = arith.constant 3.125000e-02 : f32
    %8 = vector.broadcast %cst_3 : f32 to vector<16x1xf32>
    %9 = arith.mulf %5, %8 : vector<16x1xf32>
    %10 = arith.mulf %7, %7 : vector<16x1xf32>
    %11 = arith.subf %9, %10 : vector<16x1xf32>
    %cst_4 = arith.constant 0.000000e+00 : f32
    %12 = vector.broadcast %cst_4 : f32 to vector<16x1xf32>
    %13 = arith.maximumf %11, %12 : vector<16x1xf32>
    %cst_5 = arith.constant 9.99999974E-6 : f32
    %14 = vector.broadcast %cst_5 : f32 to vector<16x1xf32>
    %15 = arith.addf %13, %14 : vector<16x1xf32>
    %16 = math.rsqrt %15 : vector<16x1xf32>
    %17 = vector.broadcast %7 : vector<16x1xf32> to vector<16x128xf32>
    %18 = arith.subf %0, %17 : vector<16x128xf32>
    %19 = vector.broadcast %16 : vector<16x1xf32> to vector<16x128xf32>
    %20 = arith.mulf %18, %19 : vector<16x128xf32>
    %c0_6 = arith.constant 0 : index
    %c0_7 = arith.constant 0 : index
    %21 = vector.load %arg2[%c0_6, %c0_7] : memref<1x128xf32, #tpu.memory_space<vmem>>, vector<1x128xf32>
    %22 = vector.broadcast %21 : vector<1x128xf32> to vector<16x128xf32>
    %23 = arith.mulf %20, %22 : vector<16x128xf32>
    %c0_8 = arith.constant 0 : index
    %c0_9 = arith.constant 0 : index
    %24 = vector.load %arg3[%c0_8, %c0_9] : memref<1x128xf32, #tpu.memory_space<vmem>>, vector<1x128xf32>
    %25 = vector.broadcast %24 : vector<1x128xf32> to vector<16x128xf32>
    %26 = arith.addf %23, %25 : vector<16x128xf32>
    %c0_10 = arith.constant 0 : index
    %c0_11 = arith.constant 0 : index
    %27 = vector.load %arg4[%c0_10, %c0_11] : memref<128x128xf32, #tpu.memory_space<vmem>>, vector<128x128xf32>
    %cst_12 = arith.constant dense<0.000000e+00> : vector<16x128xf32>
    %28 = tpu.matmul %26, %27, %cst_12 {dimension_numbers = #tpu.dot_dimension_numbers<[1], [0], [0], [1], [0, 0, 1, 1], [], []>} : vector<16x128xf32>, vector<128x128xf32>, vector<16x128xf32> -> vector<16x128xf32>
    %c0_13 = arith.constant 0 : index
    %c0_14 = arith.constant 0 : index
    %29 = vector.load %arg5[%c0_13, %c0_14] : memref<1x128xf32, #tpu.memory_space<vmem>>, vector<1x128xf32>
    %30 = vector.broadcast %29 : vector<1x128xf32> to vector<16x128xf32>
    %31 = arith.addf %28, %30 : vector<16x128xf32>
    %c0_15 = arith.constant 0 : index
    %c0_16 = arith.constant 0 : index
    %32 = vector.load %arg6[%c0_15, %c0_16] : memref<16x128xf32, #tpu.memory_space<vmem>>, vector<16x128xf32>
    tpu.vector_store %arg6[%c0_15, %c0_16], %31 {strides = array<i32>} : memref<16x128xf32, #tpu.memory_space<vmem>>, vector<16x128xf32>,
    return
  }
  func.func @transform_0(%arg0: i32) -> (i32, i32) {
    %c0_i32 = arith.constant 0 : i32
    %c0_i32_0 = arith.constant 0 : i32
    return %arg0, %c0_i32 : i32, i32
  }
  func.func @transform_1(%arg0: i32) -> (i32, i32) {
    %c0_i32 = arith.constant 0 : i32
    %c0_i32_0 = arith.constant 0 : i32
    %c0_i32_1 = arith.constant 0 : i32
    return %c0_i32, %c0_i32_0 : i32, i32
  }
  func.func @transform_2(%arg0: i32) -> (i32, i32) {
    %c0_i32 = arith.constant 0 : i32
    %c0_i32_0 = arith.constant 0 : i32
    %c0_i32_1 = arith.constant 0 : i32
    return %c0_i32, %c0_i32_0 : i32, i32
  }
  func.func @transform_3(%arg0: i32) -> (i32, i32) {
    %c0_i32 = arith.constant 0 : i32
    %c0_i32_0 = arith.constant 0 : i32
    %c0_i32_1 = arith.constant 0 : i32
    return %c0_i32, %c0_i32_0 : i32, i32
  }
  func.func @transform_4(%arg0: i32) -> (i32, i32) {
    %c0_i32 = arith.constant 0 : i32
    %c0_i32_0 = arith.constant 0 : i32
    %c0_i32_1 = arith.constant 0 : i32
    return %c0_i32, %c0_i32_0 : i32, i32
  }
  func.func @transform_5(%arg0: i32) -> (i32, i32) {
    %c0_i32 = arith.constant 0 : i32
    %c0_i32_0 = arith.constant 0 : i32
    return %arg0, %c0_i32 : i32, i32
  }
}

</mosaic_0001>

<bundles_post_ra>
// kernel: tpu_custom_call.1
= control target key start
LH: loop header
LB: loop body
LE: loop exit
PB: predicated region body
PF: predicated region fallthrough
CT: control target
= control target key end

     0   :  { %10 = vsyncpa [#allocation3], 0  ;;  %s397_s0 = inlined_call_operand.hbm [shape: f32[16,128], index: 0, kind: input, shape index: {}]   ;;  %s398_s1 = inlined_call_operand.hbm [shape: f32[1,128], index: 1, kind: input, shape index: {}]   ;;  %s399_s2 = inlined_call_operand.vmem [shape: f32[1,128], index: 2, kind: input, shape index: {}]   ;;  %s400_s3 = inlined_call_operand.hbm [shape: f32[128,128], index: 3, kind: input, shape index: {}]   ;;  %s401_s4 = inlined_call_operand.vmem [shape: f32[1,128], index: 4, kind: input, shape index: {}]   ;;  %s402_s5 = inlined_call_operand.hbm [shape: f32[16,128], index: 5, kind: output, shape index: {}]  }
   0x1   :  { %11 = vsyncpa [#allocation6], 0  ;;  %s31_s20 = sshll.u32 %s398_s1, 4  ;;  %s32_s20 = int_to_ptr.hbm [resolvable:$true] %s31_s20 }
   0x2   :  { %12 = vsyncpa [#allocation4], 0  ;;  %s322_s21 = smov [#allocation5]   ;;  %s17_s25 = sshll.u32 %s397_s0, 4  ;;  %s18_s25 = int_to_ptr.hbm [resolvable:$true] %s17_s25 }
   0x3   :  { %s33_s22 = sshll.u32 %s322_s21, 4  ;;  %s323_s26 = smov [#allocation2]   ;;  %s34_s22 = int_to_ptr.vmem [resolvable:$true] %s33_s22 }
   0x4   :  { %36 = dma.hbm_to_vmem [thread:$0]  %s32_s20, 16, %s34_s22, [#allocation6]  }
   0x5   :  { %s19_s27 = sshll.u32 %s323_s26, 4  ;;  %s324_s28 = smov 128   ;;  %s20_s27 = int_to_ptr.vmem [resolvable:$true] %s19_s27 }
   0x6   :  { %s325_s29 = smov 8   ;;  %s43_s6 = sshll.u32 %s400_s3, 4  ;;  %s44_s6 = int_to_ptr.hbm [resolvable:$true] %s43_s6 }
   0x7   :  { %25 = dma.hbm_to_vmem [thread:$0]  %s18_s25, 256, %s20_s27, [#allocation3], %s324_s28, %s324_s28, %s325_s29  }
   0x8   :  { %s326_s7 = smov [#allocation7]  }
   0x9   :  { %s45_s8 = sshll.u32 %s326_s7, 4  ;;  %s46_s8 = int_to_ptr.vmem [resolvable:$true] %s45_s8 }
   0xa   :  { %51 = dma.hbm_to_vmem [thread:$0]  %s44_s6, 2048, %s46_s8, [#allocation6], %s324_s28, %s324_s28, %s325_s29  }
   0xb   :  { %316 = dma.done.wait [#allocation3], 256  }
   0xc   :  { %317 = vsyncadd [#allocation3], 4294967040 }
   0xd   :  { %318 = dma.done.wait [#allocation6], 2064  }
   0xe   :  { %319 = vsyncadd [#allocation6], 4294965232  ;;  %v373_v0 = vld [vmem:[#allocation2] sm:$0xff]  ;;  %v378_v2 = vld [vmem:[#allocation2 + $0x8] sm:$0xff]  ;;  %s177_s14 = sshll.u32 %s402_s5, 4  ;;  %s178_s14 = int_to_ptr.hbm [resolvable:$true] %s177_s14 }
   0xf   :  { %68 = vadd.xlane.f32.xlu0 %v373_v0  ;;  %v72_v1 = vmul.f32 %v373_v0, %v373_v0  ;;  %v73_v3 = vmul.f32 %v378_v2, %v378_v2  ;;  %v141_v4 = vld [vmem:[#allocation7 + $0x78] sm:$0xff]  ;;  %v140_v5 = vld [vmem:[#allocation7 + $0x70] sm:$0xff]  ;;  %v139_v6 = vld [vmem:[#allocation7 + $0x68] sm:$0xff] }
  0x10   :  { %146 = vmatpush.msra.mxu0 %v141_v4  ;;  %191 = vmatpush.msra.mxu1 %v141_v4  ;;  %v138_v7 = vld [vmem:[#allocation7 + $0x60] sm:$0xff]  ;;  %v137_v8 = vld [vmem:[#allocation7 + $0x58] sm:$0xff]  ;;  %v136_v9 = vld [vmem:[#allocation7 + $0x50] sm:$0xff] }
  0x11   :  { %74 = vadd.xlane.f32.xlu1 %v72_v1  ;;  %v135_v10 = vld [vmem:[#allocation7 + $0x48] sm:$0xff]  ;;  %v134_v11 = vld [vmem:[#allocation7 + $0x40] sm:$0xff]  ;;  %v133_v12 = vld [vmem:[#allocation7 + $0x38] sm:$0xff] }
  0x12   :  { %147 = vmatpush.msra.mxu0 %v140_v5  ;;  %192 = vmatpush.msra.mxu1 %v140_v5  ;;  %v132_v13 = vld [vmem:[#allocation7 + $0x30] sm:$0xff]  ;;  %v131_v14 = vld [vmem:[#allocation7 + $0x28] sm:$0xff]  ;;  %v130_v15 = vld [vmem:[#allocation7 + $0x20] sm:$0xff] }
  0x13   :  { %v129_v16 = vld [vmem:[#allocation7 + $0x18] sm:$0xff]  ;;  %v128_v17 = vld [vmem:[#allocation7 + $0x10] sm:$0xff]  ;;  %v127_v19 = vld [vmem:[#allocation7 + $0x8] sm:$0xff] }
  0x14   :  { %148 = vmatpush.msra.mxu0 %v139_v6  ;;  %193 = vmatpush.msra.mxu1 %v139_v6  ;;  %v126_v21 = vld [vmem:[#allocation7] sm:$0xff]  ;;  %v213_v45 = vld [vmem:[#allocation5] ss:$0 sm:$0xff]  ;;  %v214_v49 = vld [vmem:[%s399_s2] ss:$0 sm:$0xff]  ;;  %s327_s2 = smov [#allocation8]  }
  0x15   :  { %v215_v60 = vld [vmem:[%s401_s4] ss:$0 sm:$0xff]  ;;  %s175_s11 = sshll.u32 %s327_s2, 4  ;;  %s176_s11 = int_to_ptr.vmem [resolvable:$true] %s175_s11 }
  0x16   :  { %149 = vmatpush.msra.mxu0 %v138_v7  ;;  %194 = vmatpush.msra.mxu1 %v138_v7 }
  0x17   :  { %70 = vadd.xlane.f32.xlu0 %v378_v2 }
  0x18   :  { %150 = vmatpush.msra.mxu0 %v137_v8  ;;  %195 = vmatpush.msra.mxu1 %v137_v8 }
  0x19   :  { %76 = vadd.xlane.f32.xlu1 %v73_v3 }
  0x1a   :  { %151 = vmatpush.msra.mxu0 %v136_v9  ;;  %196 = vmatpush.msra.mxu1 %v136_v9 }
  0x1c   :  { %152 = vmatpush.msra.mxu0 %v135_v10  ;;  %197 = vmatpush.msra.mxu1 %v135_v10 }
  0x1e   :  { %153 = vmatpush.msra.mxu0 %v134_v11  ;;  %198 = vmatpush.msra.mxu1 %v134_v11 }
  0x20   :  { %154 = vmatpush.msra.mxu0 %v133_v12  ;;  %199 = vmatpush.msra.mxu1 %v133_v12 }
  0x22   :  { %155 = vmatpush.msra.mxu0 %v132_v13  ;;  %200 = vmatpush.msra.mxu1 %v132_v13 }
  0x24   :  { %156 = vmatpush.msra.mxu0 %v131_v14  ;;  %201 = vmatpush.msra.mxu1 %v131_v14 }
  0x26   :  { %157 = vmatpush.msra.mxu0 %v130_v15  ;;  %202 = vmatpush.msra.mxu1 %v130_v15 }
  0x28   :  { %158 = vmatpush.msra.mxu0 %v129_v16  ;;  %203 = vmatpush.msra.mxu1 %v129_v16 }
  0x2a   :  { %159 = vmatpush.msra.mxu0 %v128_v17  ;;  %204 = vmatpush.msra.mxu1 %v128_v17 }
  0x2c   :  { %160 = vmatpush.msra.mxu0 %v127_v19  ;;  %205 = vmatpush.msra.mxu1 %v127_v19 }
  0x2e   :  { %161 = vmatpush.msra.mxu0 %v126_v21  ;;  %206 = vmatpush.msra.mxu1 %v126_v21 }
  0x82   :  { %v69_v18 = vpop.xlane.xlu0 %68 }
  0x83   :  { %v78_v20 = vmul.f32 0.03125, %v69_v18 }
  0x84   :  { %v75_v22 = vpop.xlane.xlu1 %74 }
  0x85   :  { %v82_v23 = vmul.f32 %v78_v20, %v78_v20  ;;  %v80_v24 = vmul.f32 0.03125, %v75_v22  ;;  %v110_v43 = vsub.f32 %v373_v0, %v78_v20 }
  0x87   :  { %v84_v25 = vsub.f32 %v80_v24, %v82_v23 }
  0x89   :  { %v86_v26 = vmax.f32 %v84_v25, 0.0 }
  0x8a   :  { %v71_v27 = vpop.xlane.xlu0 %70 }
  0x8b   :  { %v88_v28 = vadd.f32 1e-05, %v86_v26  ;;  %v79_v29 = vmul.f32 0.03125, %v71_v27 }
  0x8c   :  { %v77_v30 = vpop.xlane.xlu1 %76 }
  0x8d   :  { %216 = vrsqrt.f32 %v88_v28  ;;  %v83_v31 = vmul.f32 %v79_v29, %v79_v29  ;;  %v81_v32 = vmul.f32 0.03125, %v77_v30  ;;  %vm96_vm1 = vweird.f32 %v88_v28 }
  0x8e   :  { %v111_v55 = vsub.f32 %v378_v2, %v79_v29 }
  0x8f   :  { %v85_v33 = vsub.f32 %v81_v32, %v83_v31 }
  0x91   :  { %v87_v34 = vmax.f32 %v85_v33, 0.0 }
  0x93   :  { %v217_v35 = vpop.eup %216  ;;  %v89_v37 = vadd.f32 1e-05, %v87_v34 }
  0x94   :  { %v91_v36 = vmul.f32 %v217_v35, %v88_v28  ;;  %vm97_vm0 = vweird.f32 %v217_v35 }
  0x95   :  { %218 = vrsqrt.f32 %v89_v37  ;;  %vm98_vm2 = vmor %vm96_vm1, %vm97_vm0  ;;  %vm106_vm4 = vweird.f32 %v89_v37 }
  0x96   :  { %v92_v38 = vmul.f32 %v217_v35, %v91_v36 }
  0x98   :  { %v93_v39 = vmul.f32 0.5, %v92_v38 }
  0x9a   :  { %v94_v40 = vsub.f32 1.5, %v93_v39 }
  0x9b   :  { %v219_v41 = vpop.eup %218 }
  0x9c   :  { %v95_v42 = vmul.f32 %v217_v35, %v94_v40  ;;  %v101_v44 = vmul.f32 %v219_v41, %v89_v37  ;;  %vm107_vm3 = vweird.f32 %v219_v41 }
  0x9d   :  { %vm108_vm5 = vmor %vm106_vm4, %vm107_vm3 }
  0x9e   :  { %v99_v46 = vsel %vm98_vm2, %v217_v35, %v95_v42  ;;  %v102_v47 = vmul.f32 %v219_v41, %v101_v44 }
  0x9f   :  { %v112_v48 = vmul.f32 %v110_v43, %v99_v46 }
  0xa0   :  { %v103_v50 = vmul.f32 0.5, %v102_v47 }
  0xa1   :  { %v118_v51 = vmul.f32 %v213_v45, %v112_v48 }
  0xa2   :  { %v104_v52 = vsub.f32 1.5, %v103_v50 }
  0xa3   :  { %v124_v53 = vadd.f32 %v214_v49, %v118_v51 }
  0xa4   :  { %v105_v54 = vmul.f32 %v219_v41, %v104_v52 }
  0xa5   :  { %162 = vmatmul.f32.vlgmr.msra.gmra.mxu0 %v124_v53 }
  0xa6   :  { %v109_v56 = vsel %vm108_vm5, %v219_v41, %v105_v54 }
  0xa7   :  { %v113_v57 = vmul.f32 %v111_v55, %v109_v56 }
  0xa9   :  { %v119_v58 = vmul.f32 %v213_v45, %v113_v57 }
  0xab   :  { %v125_v59 = vadd.f32 %v214_v49, %v119_v58 }
  0xad   :  { %165 = vmatmul.f32.vlgmr.msra.gmra.mxu1 %v125_v59 }
 0x122   :  { %v163_v61 = vpop.f32.mrf.mxu0 }
 0x123   :  { %v164_v62 = vadd.f32 %v215_v60, %v163_v61 }
 0x125   :  { %169 = vst [vmem:[#allocation8] sm:$0xff] %v164_v62 }
 0x12a   :  { %v166_v63 = vpop.f32.mrf.mxu1 }
 0x12b   :  { %v167_v0 = vadd.f32 %v215_v60, %v166_v63 }
 0x12d   :  { %170 = vst [vmem:[#allocation8 + $0x8] sm:$0xff] %v167_v0 }
 0x12e   :  { %183 = dma.vmem_to_hbm [thread:$0]  %s176_s11, 256, %s178_s14, [#allocation4], %s324_s28, %s324_s28, %s325_s29  }
 0x12f   :  { %320 = dma.done.wait [#allocation4], 256  }
 0x130   :  { %321 = vsyncadd [#allocation4], 4294967040 }
 0x131   :  { %188 = vsyncpa [#allocation3], 1 }
 0x132   :  { %189 = vsyncpa [#allocation6], 1 }
 0x133   :  { %190 = vsyncpa [#allocation4], 1 }

</bundles_post_ra>
